<compile_context>
chip_gen: v7x
topology: tpu7x:2x2x1
jax: 0.10.0
libtpu: 0.0.40
codegen_flags: <defaults>
</compile_context>

<pallas_src>
import functools
import math

import jax
import jax.numpy as jnp
from jax.experimental import pallas as pl
from jax.experimental.pallas import tpu as pltpu


_LANE = 128      # fast (lane) axis granularity
_SUBLANE = 8     # slow (sublane) axis granularity
_TARGET_BATCH_BLOCK = 256          # fills 2x256^2 MXU, bounds activation live range
_DEFAULT_VMEM_BYTES = 64 << 20     # conservative fallback (v7x per-TC physical VMEM)


def _round_up(x, m):
    return ((x + m - 1) // m) * m


def _vmem_capacity_bytes():
    try:
        return int(pltpu.get_tpu_info().vmem_capacity_bytes)
    except Exception:  # pragma: no cover - info query unavailable
        return _DEFAULT_VMEM_BYTES


# ----------------------------------------------------------------------------
# Fused kernel: x -> [Linear+ReLU]*(L-1) -> Linear
# refs layout: (x_ref, w0, b0, w1, b1, ..., w_{L-1}, b_{L-1}, o_ref)
# Weights are bf16 (MXU operands), biases f32; accumulate / bias / ReLU in f32.
# ----------------------------------------------------------------------------
def _fused_mlp_kernel(x_ref, *refs):
    o_ref = refs[-1]
    wb = refs[:-1]
    n_layers = len(wb) // 2

    h = x_ref[...].astype(jnp.float32)                    # (Bblk, Din_pad) f32
    for i in range(n_layers):
        w = wb[2 * i][...]                                # (din_p, dout_p) bf16
        b = wb[2 * i + 1][...]                            # (1, dout_p) f32
        z = jnp.dot(h.astype(jnp.bfloat16), w,
                    preferred_element_type=jnp.float32) + b
        if i < n_layers - 1:                              # hidden layers only
            z = jnp.maximum(z, 0.0)
        h = z
    o_ref[...] = h.astype(o_ref.dtype)


# ----------------------------------------------------------------------------
# Tiling plan: batch block + explicit VMEM limit from hardware capacity.
# ----------------------------------------------------------------------------
def _plan(B, padded_params, single_buffer_weights):
    dims_pad = [padded_params[0][0].shape[0]] + [w.shape[1] for w, _ in padded_params]
    Din_pad, Dout_pad = dims_pad[0], dims_pad[-1]

    weight_bytes = sum(int(w.size) * w.dtype.itemsize + int(b.size) * b.dtype.itemsize
                       for w, b in padded_params)
    wbuf = 1 if single_buffer_weights else 2

    capacity = _vmem_capacity_bytes()
    budget = int(capacity * 0.85)          # leave headroom for compiler internals

    B8 = _round_up(max(B, _SUBLANE), _SUBLANE)
    block_b = min(_TARGET_BATCH_BLOCK, B8)

    def need(bb):
        io = 2 * bb * (Din_pad + Dout_pad) * 4     # double-buffered x / out blocks (f32)
        act = 2 * bb * max(dims_pad) * 4           # live activation + spill margin (f32)
        return wbuf * weight_bytes + io + act + (2 << 20)

    while need(block_b) > budget and block_b > _SUBLANE:
        block_b = max(_SUBLANE, _round_up(block_b // 2, _SUBLANE))

    if need(block_b) > budget:
        # TODO(synk): K-tiled ("arbitrary" reduction grid axis with an f32 VMEM
        # accumulator) or fp8-weight fallback for heads whose padded weights
        # alone exceed the per-generation VMEM budget.
        raise NotImplementedError(
            f"padded weights ({weight_bytes / 2**20:.1f} MiB) exceed the VMEM "
            f"budget ({budget / 2**20:.1f} MiB); tiled-weight path not implemented")

    vmem_limit = int(min(budget, max(need(block_b) + (4 << 20), 32 << 20)))
    return B8, block_b, vmem_limit, dims_pad, weight_bytes


# ----------------------------------------------------------------------------
# Jitted forward: (optional) pad -> fused pallas_call -> slice valid output
# ----------------------------------------------------------------------------
@functools.partial(jax.jit, static_argnames=("output_dim", "single_buffer_weights"))
def _forward_jit(x, padded_params, *, output_dim, single_buffer_weights):
    B, Din = x.shape
    Din_pad = padded_params[0][0].shape[0]
    Dout_pad = padded_params[-1][0].shape[1]

    B8, block_b, vmem_limit, dims_pad, weight_bytes = _plan(
        B, padded_params, single_buffer_weights)

    # One fused padding copy (features -> lane multiple, batch -> sublane
    # multiple); skipped entirely when x is already aligned.
    if B8 == B and Din_pad == Din:
        x_pad = x
    else:
        x_pad = jnp.zeros((B8, Din_pad), x.dtype).at[:B, :Din].set(x)

    nb = pl.cdiv(B8, block_b)      # ragged last block allowed; OOB store is masked

    flat = []
    for w, b in padded_params:
        flat.extend((w, b))

    # Weights/biases are resident (constant block index).  Single-buffer them when
    # possible — double-buffering a never-changing block only wastes VMEM.
    if single_buffer_weights:
        def wspec(shape):
            return pl.BlockSpec(shape, lambda i: (0, 0), pipeline_mode=pl.Buffered(1))
    else:
        def wspec(shape):
            return pl.BlockSpec(shape, lambda i: (0, 0))

    in_specs = [pl.BlockSpec((block_b, Din_pad), lambda i: (i, 0))]
    for w, b in padded_params:
        in_specs.append(wspec(w.shape))
        in_specs.append(wspec(b.shape))

    flops = 2 * B8 * sum(dims_pad[i] * dims_pad[i + 1] for i in range(len(dims_pad) - 1))
    bytes_accessed = (int(x_pad.size) * x_pad.dtype.itemsize
                      + weight_bytes
                      + B8 * Dout_pad * x.dtype.itemsize)
    cost = pl.CostEstimate(flops=flops, transcendentals=0,
                           bytes_accessed=bytes_accessed)

    out_pad = pl.pallas_call(
        _fused_mlp_kernel,
        out_shape=jax.ShapeDtypeStruct((B8, Dout_pad), x.dtype),
        grid=(nb,),
        in_specs=in_specs,
        out_specs=pl.BlockSpec((block_b, Dout_pad), lambda i: (i, 0)),
        compiler_params=pltpu.CompilerParams(
            dimension_semantics=("parallel",),     # batch axis -> v7x megacore sharding
            vmem_limit_bytes=vmem_limit),
        cost_estimate=cost,
    )(x_pad, *flat)

    return out_pad[:B, :output_dim]


def mlp_regression_head(x, padded_params, *, output_dim):
    """Public forward.  Prefers single-buffered resident weights; falls back to
    default buffering if this JAX/Mosaic build rejects pl.Buffered(1)."""
    try:
        return _forward_jit(x, padded_params, output_dim=output_dim,
                            single_buffer_weights=True)
    except Exception:
        return _forward_jit(x, padded_params, output_dim=output_dim,
                            single_buffer_weights=False)


# ----------------------------------------------------------------------------
# Parameter construction (matches PyTorch init) + lane-padding (bf16 weights)
# ----------------------------------------------------------------------------
def xavier_uniform(key, in_dim, out_dim, dtype=jnp.float32):
    # torch.nn.init.xavier_uniform_ (gain=1): U(-a, a), a = sqrt(6/(fan_in+fan_out))
    a = math.sqrt(6.0 / (in_dim + out_dim))
    return jax.random.uniform(key, (in_dim, out_dim), dtype, minval=-a, maxval=a)


def init_mlp_params(key, input_dim, hidden_dims, output_dim, dtype=jnp.float32):
    """Weights stored as [in, out] (transposed from PyTorch's [out, in])."""
    params = []
    dims = [input_dim] + list(hidden_dims) + [output_dim]
    for i in range(len(dims) - 1):
        key, kw, kb = jax.random.split(key, 3)
        din, dout = dims[i], dims[i + 1]
        w = xavier_uniform(kw, din, dout, dtype)
        # PyTorch Linear default bias init: U(-1/sqrt(fan_in), 1/sqrt(fan_in))
        bound = 1.0 / math.sqrt(din)
        b = jax.random.uniform(kb, (dout,), dtype, minval=-bound, maxval=bound)
        params.append((w, b))
    return params


def pad_params(params):
    """Zero-pad feature axes to multiples of 128; store weights as bf16 (MXU
    operand dtype), biases as f32.  Zero padding is exact (see header)."""
    padded = []
    for w, b in params:
        din, dout = w.shape
        din_p = _round_up(din, _LANE)
        dout_p = _round_up(dout, _LANE)
        w_p = jnp.zeros((din_p, dout_p), jnp.bfloat16).at[:din, :dout].set(
            w.astype(jnp.bfloat16))
        b_p = jnp.zeros((1, dout_p), jnp.float32).at[0, :dout].set(
            b.astype(jnp.float32))
        padded.append((w_p, b_p))
    return padded


if __name__ == "__main__":
    key = jax.random.PRNGKey(0)
    kx, kx2, kp = jax.random.split(key, 3)

    input_dim, hidden_dims, output_dim = 32, [64, 32], 4
    params = init_mlp_params(kp, input_dim, hidden_dims, output_dim)
    padded_params = pad_params(params)

    def reference(x):
        # Pure-JAX reference emulating the kernel's bf16-operand / f32-accumulate
        # matmuls (zero padding is exact, so padded == unpadded).
        h = x
        for i, (w, b) in enumerate(params):
            z = jnp.dot(h.astype(jnp.bfloat16), w.astype(jnp.bfloat16),
                        preferred_element_type=jnp.float32) + b
            h = jnp.maximum(z, 0.0) if i < len(params) - 1 else z
        return h

    # 1) Small batch: single grid step, whole problem resident in VMEM.
    x_small = jax.random.normal(kx, (8, input_dim), jnp.float32)
    out_small = jax.block_until_ready(
        mlp_regression_head(x_small, padded_params, output_dim=output_dim))
    assert out_small.shape == (8, output_dim), out_small.shape
    ref_small = reference(x_small)
    assert jnp.allclose(out_small, ref_small, atol=2e-3, rtol=2e-3), float(
        jnp.max(jnp.abs(out_small - ref_small)))

    # 2) Larger, non-aligned batch: multi-step batch grid with a ragged last block
    #    (exercises the parallel grid path and masked OOB stores).
    x_big = jax.random.normal(kx2, (521, input_dim), jnp.float32)
    out_big = jax.block_until_ready(
        mlp_regression_head(x_big, padded_params, output_dim=output_dim))
    assert out_big.shape == (521, output_dim), out_big.shape
    ref_big = reference(x_big)
    assert jnp.allclose(out_big, ref_big, atol=2e-3, rtol=2e-3), float(
        jnp.max(jnp.abs(out_big - ref_big)))

    print("KERNEL_OK")
</pallas_src>

<mosaic_0001>
module attributes {stable_mosaic.version = 11 : i64} {
  func.func @_fused_mlp_kernel(%arg0: i32, %arg1: memref<8x128xf32, #tpu.memory_space<vmem>>, %arg2: memref<128x128xbf16, #tpu.memory_space<vmem>>, %arg3: memref<1x128xf32, #tpu.memory_space<vmem>>, %arg4: memref<128x128xbf16, #tpu.memory_space<vmem>>, %arg5: memref<1x128xf32, #tpu.memory_space<vmem>>, %arg6: memref<128x128xbf16, #tpu.memory_space<vmem>>, %arg7: memref<1x128xf32, #tpu.memory_space<vmem>>, %arg8: memref<8x128xf32, #tpu.memory_space<vmem>>) attributes {dimension_semantics = [#tpu.dimension_semantics<parallel>], iteration_bounds = array<i64: 1>, scalar_prefetch = 0 : i64, scratch_operands = 0 : i64, tpu.core_type = #tpu.core_type<tc>, window_params = [{transform_indices = @transform_0, window_bounds = array<i64: 8, 128>}, {pipeline_mode = #tpu.pipeline_mode<synchronous>, transform_indices = @transform_1, window_bounds = array<i64: 128, 128>}, {pipeline_mode = #tpu.pipeline_mode<synchronous>, transform_indices = @transform_2, window_bounds = array<i64: 1, 128>}, {pipeline_mode = #tpu.pipeline_mode<synchronous>, transform_indices = @transform_3, window_bounds = array<i64: 128, 128>}, {pipeline_mode = #tpu.pipeline_mode<synchronous>, transform_indices = @transform_4, window_bounds = array<i64: 1, 128>}, {pipeline_mode = #tpu.pipeline_mode<synchronous>, transform_indices = @transform_5, window_bounds = array<i64: 128, 128>}, {pipeline_mode = #tpu.pipeline_mode<synchronous>, transform_indices = @transform_6, window_bounds = array<i64: 1, 128>}, {transform_indices = @transform_7, window_bounds = array<i64: 8, 128>}]} {
    %c0 = arith.constant 0 : index
    %c0_0 = arith.constant 0 : index
    %0 = vector.load %arg1[%c0, %c0_0] : memref<8x128xf32, #tpu.memory_space<vmem>>, vector<8x128xf32>
    %c0_1 = arith.constant 0 : index
    %c0_2 = arith.constant 0 : index
    %1 = vector.load %arg2[%c0_1, %c0_2] : memref<128x128xbf16, #tpu.memory_space<vmem>>, vector<128x128xbf16>
    %c0_3 = arith.constant 0 : index
    %c0_4 = arith.constant 0 : index
    %2 = vector.load %arg3[%c0_3, %c0_4] : memref<1x128xf32, #tpu.memory_space<vmem>>, vector<1x128xf32>
    %3 = arith.truncf %0 : vector<8x128xf32> to vector<8x128xbf16>
    %cst = arith.constant dense<0.000000e+00> : vector<8x128xf32>
    %4 = tpu.matmul %3, %1, %cst {dimension_numbers = #tpu.dot_dimension_numbers<[1], [0], [0], [1], [0, 0, 1, 1], [], []>} : vector<8x128xbf16>, vector<128x128xbf16>, vector<8x128xf32> -> vector<8x128xf32>
    %5 = vector.broadcast %2 : vector<1x128xf32> to vector<8x128xf32>
    %6 = arith.addf %4, %5 : vector<8x128xf32>
    %cst_5 = arith.constant 0.000000e+00 : f32
    %7 = vector.broadcast %cst_5 : f32 to vector<8x128xf32>
    %8 = arith.maximumf %6, %7 : vector<8x128xf32>
    %c0_6 = arith.constant 0 : index
    %c0_7 = arith.constant 0 : index
    %9 = vector.load %arg4[%c0_6, %c0_7] : memref<128x128xbf16, #tpu.memory_space<vmem>>, vector<128x128xbf16>
    %c0_8 = arith.constant 0 : index
    %c0_9 = arith.constant 0 : index
    %10 = vector.load %arg5[%c0_8, %c0_9] : memref<1x128xf32, #tpu.memory_space<vmem>>, vector<1x128xf32>
    %11 = arith.truncf %8 : vector<8x128xf32> to vector<8x128xbf16>
    %cst_10 = arith.constant dense<0.000000e+00> : vector<8x128xf32>
    %12 = tpu.matmul %11, %9, %cst_10 {dimension_numbers = #tpu.dot_dimension_numbers<[1], [0], [0], [1], [0, 0, 1, 1], [], []>} : vector<8x128xbf16>, vector<128x128xbf16>, vector<8x128xf32> -> vector<8x128xf32>
    %13 = vector.broadcast %10 : vector<1x128xf32> to vector<8x128xf32>
    %14 = arith.addf %12, %13 : vector<8x128xf32>
    %cst_11 = arith.constant 0.000000e+00 : f32
    %15 = vector.broadcast %cst_11 : f32 to vector<8x128xf32>
    %16 = arith.maximumf %14, %15 : vector<8x128xf32>
    %c0_12 = arith.constant 0 : index
    %c0_13 = arith.constant 0 : index
    %17 = vector.load %arg6[%c0_12, %c0_13] : memref<128x128xbf16, #tpu.memory_space<vmem>>, vector<128x128xbf16>
    %c0_14 = arith.constant 0 : index
    %c0_15 = arith.constant 0 : index
    %18 = vector.load %arg7[%c0_14, %c0_15] : memref<1x128xf32, #tpu.memory_space<vmem>>, vector<1x128xf32>
    %19 = arith.truncf %16 : vector<8x128xf32> to vector<8x128xbf16>
    %cst_16 = arith.constant dense<0.000000e+00> : vector<8x128xf32>
    %20 = tpu.matmul %19, %17, %cst_16 {dimension_numbers = #tpu.dot_dimension_numbers<[1], [0], [0], [1], [0, 0, 1, 1], [], []>} : vector<8x128xbf16>, vector<128x128xbf16>, vector<8x128xf32> -> vector<8x128xf32>
    %21 = vector.broadcast %18 : vector<1x128xf32> to vector<8x128xf32>
    %22 = arith.addf %20, %21 : vector<8x128xf32>
    %c0_17 = arith.constant 0 : index
    %c0_18 = arith.constant 0 : index
    %23 = vector.load %arg8[%c0_17, %c0_18] : memref<8x128xf32, #tpu.memory_space<vmem>>, vector<8x128xf32>
    tpu.vector_store %arg8[%c0_17, %c0_18], %22 {strides = array<i32>} : memref<8x128xf32, #tpu.memory_space<vmem>>, vector<8x128xf32>,
    return
  }
  func.func @transform_0(%arg0: i32) -> (i32, i32) {
    %c0_i32 = arith.constant 0 : i32
    %c0_i32_0 = arith.constant 0 : i32
    return %arg0, %c0_i32 : i32, i32
  }
  func.func @transform_1(%arg0: i32) -> (i32, i32) {
    %c0_i32 = arith.constant 0 : i32
    %c0_i32_0 = arith.constant 0 : i32
    %c0_i32_1 = arith.constant 0 : i32
    return %c0_i32, %c0_i32_0 : i32, i32
  }
  func.func @transform_2(%arg0: i32) -> (i32, i32) {
    %c0_i32 = arith.constant 0 : i32
    %c0_i32_0 = arith.constant 0 : i32
    %c0_i32_1 = arith.constant 0 : i32
    return %c0_i32, %c0_i32_0 : i32, i32
  }
  func.func @transform_3(%arg0: i32) -> (i32, i32) {
    %c0_i32 = arith.constant 0 : i32
    %c0_i32_0 = arith.constant 0 : i32
    %c0_i32_1 = arith.constant 0 : i32
    return %c0_i32, %c0_i32_0 : i32, i32
  }
  func.func @transform_4(%arg0: i32) -> (i32, i32) {
    %c0_i32 = arith.constant 0 : i32
    %c0_i32_0 = arith.constant 0 : i32
    %c0_i32_1 = arith.constant 0 : i32
    return %c0_i32, %c0_i32_0 : i32, i32
  }
  func.func @transform_5(%arg0: i32) -> (i32, i32) {
    %c0_i32 = arith.constant 0 : i32
    %c0_i32_0 = arith.constant 0 : i32
    %c0_i32_1 = arith.constant 0 : i32
    return %c0_i32, %c0_i32_0 : i32, i32
  }
  func.func @transform_6(%arg0: i32) -> (i32, i32) {
    %c0_i32 = arith.constant 0 : i32
    %c0_i32_0 = arith.constant 0 : i32
    %c0_i32_1 = arith.constant 0 : i32
    return %c0_i32, %c0_i32_0 : i32, i32
  }
  func.func @transform_7(%arg0: i32) -> (i32, i32) {
    %c0_i32 = arith.constant 0 : i32
    %c0_i32_0 = arith.constant 0 : i32
    return %arg0, %c0_i32 : i32, i32
  }
}

module attributes {stable_mosaic.version = 11 : i64} {
  func.func @_fused_mlp_kernel(%arg0: i32, %arg1: memref<8x128xf32, #tpu.memory_space<vmem>>, %arg2: memref<128x128xbf16, #tpu.memory_space<vmem>>, %arg3: memref<1x128xf32, #tpu.memory_space<vmem>>, %arg4: memref<128x128xbf16, #tpu.memory_space<vmem>>, %arg5: memref<1x128xf32, #tpu.memory_space<vmem>>, %arg6: memref<128x128xbf16, #tpu.memory_space<vmem>>, %arg7: memref<1x128xf32, #tpu.memory_space<vmem>>, %arg8: memref<8x128xf32, #tpu.memory_space<vmem>>) attributes {dimension_semantics = [#tpu.dimension_semantics<parallel>], iteration_bounds = array<i64: 1>, scalar_prefetch = 0 : i64, scratch_operands = 0 : i64, tpu.core_type = #tpu.core_type<tc>, window_params = [{transform_indices = @transform_0, window_bounds = array<i64: 8, 128>}, {pipeline_mode = #tpu.pipeline_mode<synchronous>, transform_indices = @transform_1, window_bounds = array<i64: 128, 128>}, {pipeline_mode = #tpu.pipeline_mode<synchronous>, transform_indices = @transform_2, window_bounds = array<i64: 1, 128>}, {pipeline_mode = #tpu.pipeline_mode<synchronous>, transform_indices = @transform_3, window_bounds = array<i64: 128, 128>}, {pipeline_mode = #tpu.pipeline_mode<synchronous>, transform_indices = @transform_4, window_bounds = array<i64: 1, 128>}, {pipeline_mode = #tpu.pipeline_mode<synchronous>, transform_indices = @transform_5, window_bounds = array<i64: 128, 128>}, {pipeline_mode = #tpu.pipeline_mode<synchronous>, transform_indices = @transform_6, window_bounds = array<i64: 1, 128>}, {transform_indices = @transform_7, window_bounds = array<i64: 8, 128>}]} {
    %c0 = arith.constant 0 : index
    %c0_0 = arith.constant 0 : index
    %0 = vector.load %arg1[%c0, %c0_0] : memref<8x128xf32, #tpu.memory_space<vmem>>, vector<8x128xf32>
    %c0_1 = arith.constant 0 : index
    %c0_2 = arith.constant 0 : index
    %1 = vector.load %arg2[%c0_1, %c0_2] : memref<128x128xbf16, #tpu.memory_space<vmem>>, vector<128x128xbf16>
    %c0_3 = arith.constant 0 : index
    %c0_4 = arith.constant 0 : index
    %2 = vector.load %arg3[%c0_3, %c0_4] : memref<1x128xf32, #tpu.memory_space<vmem>>, vector<1x128xf32>
    %3 = arith.truncf %0 : vector<8x128xf32> to vector<8x128xbf16>
    %cst = arith.constant dense<0.000000e+00> : vector<8x128xf32>
    %4 = tpu.matmul %3, %1, %cst {dimension_numbers = #tpu.dot_dimension_numbers<[1], [0], [0], [1], [0, 0, 1, 1], [], []>} : vector<8x128xbf16>, vector<128x128xbf16>, vector<8x128xf32> -> vector<8x128xf32>
    %5 = vector.broadcast %2 : vector<1x128xf32> to vector<8x128xf32>
    %6 = arith.addf %4, %5 : vector<8x128xf32>
    %cst_5 = arith.constant 0.000000e+00 : f32
    %7 = vector.broadcast %cst_5 : f32 to vector<8x128xf32>
    %8 = arith.maximumf %6, %7 : vector<8x128xf32>
    %c0_6 = arith.constant 0 : index
    %c0_7 = arith.constant 0 : index
    %9 = vector.load %arg4[%c0_6, %c0_7] : memref<128x128xbf16, #tpu.memory_space<vmem>>, vector<128x128xbf16>
    %c0_8 = arith.constant 0 : index
    %c0_9 = arith.constant 0 : index
    %10 = vector.load %arg5[%c0_8, %c0_9] : memref<1x128xf32, #tpu.memory_space<vmem>>, vector<1x128xf32>
    %11 = arith.truncf %8 : vector<8x128xf32> to vector<8x128xbf16>
    %cst_10 = arith.constant dense<0.000000e+00> : vector<8x128xf32>
    %12 = tpu.matmul %11, %9, %cst_10 {dimension_numbers = #tpu.dot_dimension_numbers<[1], [0], [0], [1], [0, 0, 1, 1], [], []>} : vector<8x128xbf16>, vector<128x128xbf16>, vector<8x128xf32> -> vector<8x128xf32>
    %13 = vector.broadcast %10 : vector<1x128xf32> to vector<8x128xf32>
    %14 = arith.addf %12, %13 : vector<8x128xf32>
    %cst_11 = arith.constant 0.000000e+00 : f32
    %15 = vector.broadcast %cst_11 : f32 to vector<8x128xf32>
    %16 = arith.maximumf %14, %15 : vector<8x128xf32>
    %c0_12 = arith.constant 0 : index
    %c0_13 = arith.constant 0 : index
    %17 = vector.load %arg6[%c0_12, %c0_13] : memref<128x128xbf16, #tpu.memory_space<vmem>>, vector<128x128xbf16>
    %c0_14 = arith.constant 0 : index
    %c0_15 = arith.constant 0 : index
    %18 = vector.load %arg7[%c0_14, %c0_15] : memref<1x128xf32, #tpu.memory_space<vmem>>, vector<1x128xf32>
    %19 = arith.truncf %16 : vector<8x128xf32> to vector<8x128xbf16>
    %cst_16 = arith.constant dense<0.000000e+00> : vector<8x128xf32>
    %20 = tpu.matmul %19, %17, %cst_16 {dimension_numbers = #tpu.dot_dimension_numbers<[1], [0], [0], [1], [0, 0, 1, 1], [], []>} : vector<8x128xbf16>, vector<128x128xbf16>, vector<8x128xf32> -> vector<8x128xf32>
    %21 = vector.broadcast %18 : vector<1x128xf32> to vector<8x128xf32>
    %22 = arith.addf %20, %21 : vector<8x128xf32>
    %c0_17 = arith.constant 0 : index
    %c0_18 = arith.constant 0 : index
    %23 = vector.load %arg8[%c0_17, %c0_18] : memref<8x128xf32, #tpu.memory_space<vmem>>, vector<8x128xf32>
    tpu.vector_store %arg8[%c0_17, %c0_18], %22 {strides = array<i32>} : memref<8x128xf32, #tpu.memory_space<vmem>>, vector<8x128xf32>,
    return
  }
  func.func @transform_0(%arg0: i32) -> (i32, i32) {
    %c0_i32 = arith.constant 0 : i32
    %c0_i32_0 = arith.constant 0 : i32
    return %arg0, %c0_i32 : i32, i32
  }
  func.func @transform_1(%arg0: i32) -> (i32, i32) {
    %c0_i32 = arith.constant 0 : i32
    %c0_i32_0 = arith.constant 0 : i32
    %c0_i32_1 = arith.constant 0 : i32
    return %c0_i32, %c0_i32_0 : i32, i32
  }
  func.func @transform_2(%arg0: i32) -> (i32, i32) {
    %c0_i32 = arith.constant 0 : i32
    %c0_i32_0 = arith.constant 0 : i32
    %c0_i32_1 = arith.constant 0 : i32
    return %c0_i32, %c0_i32_0 : i32, i32
  }
  func.func @transform_3(%arg0: i32) -> (i32, i32) {
    %c0_i32 = arith.constant 0 : i32
    %c0_i32_0 = arith.constant 0 : i32
    %c0_i32_1 = arith.constant 0 : i32
    return %c0_i32, %c0_i32_0 : i32, i32
  }
  func.func @transform_4(%arg0: i32) -> (i32, i32) {
    %c0_i32 = arith.constant 0 : i32
    %c0_i32_0 = arith.constant 0 : i32
    %c0_i32_1 = arith.constant 0 : i32
    return %c0_i32, %c0_i32_0 : i32, i32
  }
  func.func @transform_5(%arg0: i32) -> (i32, i32) {
    %c0_i32 = arith.constant 0 : i32
    %c0_i32_0 = arith.constant 0 : i32
    %c0_i32_1 = arith.constant 0 : i32
    return %c0_i32, %c0_i32_0 : i32, i32
  }
  func.func @transform_6(%arg0: i32) -> (i32, i32) {
    %c0_i32 = arith.constant 0 : i32
    %c0_i32_0 = arith.constant 0 : i32
    %c0_i32_1 = arith.constant 0 : i32
    return %c0_i32, %c0_i32_0 : i32, i32
  }
  func.func @transform_7(%arg0: i32) -> (i32, i32) {
    %c0_i32 = arith.constant 0 : i32
    %c0_i32_0 = arith.constant 0 : i32
    return %arg0, %c0_i32 : i32, i32
  }
}

</mosaic_0001>

<bundles_post_ra>
// kernel: _forward_jit.1
= control target key start
LH: loop header
LB: loop body
LE: loop exit
PB: predicated region body
PF: predicated region fallthrough
CT: control target
= control target key end

     0   :  { %12 = vsyncpa [#allocation3], 0  ;;  %s773_s0 = inlined_call_operand.vmem [shape: f32[8,128], index: 0, kind: input, shape index: {}]   ;;  %s774_s1 = inlined_call_operand.hbm [shape: bf16[128,128], index: 1, kind: input, shape index: {}]   ;;  %s775_s2 = inlined_call_operand.vmem [shape: f32[1,128], index: 2, kind: input, shape index: {}]   ;;  %s776_s3 = inlined_call_operand.hbm [shape: bf16[128,128], index: 3, kind: input, shape index: {}]   ;;  %s777_s4 = inlined_call_operand.vmem [shape: f32[1,128], index: 4, kind: input, shape index: {}]   ;;  %s778_s5 = inlined_call_operand.hbm [shape: bf16[128,128], index: 5, kind: input, shape index: {}]   ;;  %s779_s6 = inlined_call_operand.vmem [shape: f32[1,128], index: 6, kind: input, shape index: {}]   ;;  %s780_s7 = inlined_call_operand.vmem [shape: f32[8,128], index: 7, kind: output, shape index: {}]  }
   0x1   :  { %13 = vsyncpa [#allocation5], 0  ;;  %s629_s24 = smov [#allocation4]   ;;  %s630_s26 = smov [#allocation2]  }
   0x2   :  { %s35_s25 = sshll.u32 %s629_s24, 4  ;;  %s21_s27 = sshll.u32 %s630_s26, 4  ;;  %s36_s25 = int_to_ptr.vmem [resolvable:$true] %s35_s25  ;;  %s676_s27 = int_to_ptr.vmem [resolvable:$true] %s21_s27 }
   0x3   :  { %s559_s30 = scalar_lea.hbm %s776_s3, 1024 }
   0x4   :  { %p560_p0 = scmp.ne.s32.totalorder %s776_s3, %s559_s30  ;;  %p563_p1 = scmp.lt.u32.totalorder %s559_s30, %s776_s3 }
   0x6   :  { %p565_p2 = pnand %p563_p1, %p560_p0 }
   0x8   :  { %568 = shalt.err (!%p565_p2)
}
   0x9   :  { %s569_s12 = scalar_lea.vmem %s36_s25, 1024  ;;  %p574_p4 = scmp.lt.s32.totalorder %s36_s25, %s36_s25 }
   0xa   :  { %p570_p3 = scmp.ne.s32.totalorder %s36_s25, %s569_s12  ;;  %p575_p5 = scmp.lt.s32.totalorder %s569_s12, %s569_s12 }
   0xc   :  { %p576_p6 = por %p575_p5, %p574_p4 }
   0xe   :  { %p577_p7 = pnand %p576_p6, %p570_p3 }
  0x10   :  { %580 = shalt.err (!%p577_p7)
}
  0x11   :  { %s631_s13 = smov 64   ;;  %s632_s14 = smov 4  }
  0x12   :  { %41 = dma.hbm_to_vmem [thread:$0]  %s776_s3, 1024, %s36_s25, [#allocation5], %s631_s13, %s631_s13, %s632_s14  }
  0x13   :  { %s581_s19 = scalar_lea.hbm %s774_s1, 1024 }
  0x14   :  { %p582_p8 = scmp.ne.s32.totalorder %s774_s1, %s581_s19  ;;  %p585_p9 = scmp.lt.u32.totalorder %s581_s19, %s774_s1 }
  0x16   :  { %p587_p10 = pnand %p585_p9, %p582_p8 }
  0x18   :  { %590 = shalt.err (!%p587_p10)
}
  0x19   :  { %s591_s24 = scalar_lea.vmem %s676_s27, 1024  ;;  %p596_p12 = scmp.lt.s32.totalorder %s676_s27, %s676_s27 }
  0x1a   :  { %p592_p11 = scmp.ne.s32.totalorder %s676_s27, %s591_s24  ;;  %p597_p13 = scmp.lt.s32.totalorder %s591_s24, %s591_s24 }
  0x1c   :  { %p598_p0 = por %p597_p13, %p596_p12 }
  0x1e   :  { %p599_p1 = pnand %p598_p0, %p592_p11 }
  0x20   :  { %602 = shalt.err (!%p599_p1)
}
  0x21   :  { %27 = dma.hbm_to_vmem [thread:$0]  %s774_s1, 1024, %s676_s27, [#allocation3], %s631_s13, %s631_s13, %s632_s14  }
  0x22   :  { %s633_s26 = smov [#allocation6]   ;;  %s603_s8 = scalar_lea.hbm %s778_s5, 1024 }
  0x23   :  { %s49_s28 = sshll.u32 %s633_s26, 4  ;;  %p604_p2 = scmp.ne.s32.totalorder %s778_s5, %s603_s8  ;;  %s50_s28 = int_to_ptr.vmem [resolvable:$true] %s49_s28 }
  0x24   :  { %p607_p3 = scmp.lt.u32.totalorder %s603_s8, %s778_s5 }
  0x26   :  { %p609_p4 = pnand %p607_p3, %p604_p2 }
  0x28   :  { %612 = shalt.err (!%p609_p4)
}
  0x29   :  { %s613_s15 = scalar_lea.vmem %s50_s28, 1024  ;;  %p618_p6 = scmp.lt.s32.totalorder %s50_s28, %s50_s28 }
  0x2a   :  { %p614_p5 = scmp.ne.s32.totalorder %s50_s28, %s613_s15  ;;  %p619_p7 = scmp.lt.s32.totalorder %s613_s15, %s613_s15 }
  0x2c   :  { %p620_p8 = por %p619_p7, %p618_p6 }
  0x2e   :  { %p621_p9 = pnand %p620_p8, %p614_p5 }
  0x30   :  { %624 = shalt.err (!%p621_p9)
}
  0x31   :  { %55 = dma.hbm_to_vmem [thread:$0]  %s778_s5, 1024, %s50_s28, [#allocation5], %s631_s13, %s631_s13, %s632_s14  }
  0x32   :  { %625 = dma.done.wait [#allocation3], 1024  }
  0x33   :  { %626 = vsyncadd [#allocation3], 4294966272 }
  0x34   :  { %627 = dma.done.wait [#allocation5], 2048  }
  0x35   :  { %628 = vsyncadd [#allocation5], 4294965248  ;;  %v634_v0 = vmov 0.0   ;;  %vm635_vm0 = vmmov 0   ;;  %v535_v1 = vld [vmem:[#allocation2] sm:$0xff]   ;;  %v536_v2 = vld [vmem:[#allocation2 + $0x8] sm:$0xff]  }
  0x36   :  { %468 = vmatprep.subr.bf16.mxu0 %v634_v0  ;;  %484 = vmatprep.mubr.msk.bf16.mxu0 %vm635_vm0, %v634_v0  ;;  %v537_v3 = vld [vmem:[#allocation2 + $0x10] sm:$0xff]   ;;  %v543_v4 = vld [vmem:[#allocation4] sm:$0xff]   ;;  %v538_v5 = vld [vmem:[#allocation2 + $0x18] sm:$0xff]  }
  0x37   :  { %488 = vmatprep.subr.bf16.mxu1 %v634_v0  ;;  %504 = vmatprep.mubr.msk.bf16.mxu1 %vm635_vm0, %v634_v0  ;;  %v544_v6 = vld [vmem:[#allocation4 + $0x8] sm:$0xff]   ;;  %v539_v7 = vld [vmem:[#allocation2 + $0x20] sm:$0xff]   ;;  %v545_v8 = vld [vmem:[#allocation4 + $0x10] sm:$0xff]  }
  0x38   :  { %469 = vmatpush3.bf16.msra.mxu0 %v535_v1  ;;  %489 = vmatpush3.bf16.msra.mxu1 %v543_v4  ;;  %v540_v9 = vld [vmem:[#allocation2 + $0x28] sm:$0xff]   ;;  %v546_v10 = vld [vmem:[#allocation4 + $0x18] sm:$0xff]   ;;  %v541_v11 = vld [vmem:[#allocation2 + $0x30] sm:$0xff]  }
  0x39   :  { %470 = vmatprep.subr.bf16.mxu0 %v634_v0  ;;  %490 = vmatprep.subr.bf16.mxu1 %v634_v0  ;;  %v547_v12 = vld [vmem:[#allocation4 + $0x20] sm:$0xff]   ;;  %v542_v13 = vld [vmem:[#allocation2 + $0x38] sm:$0xff]   ;;  %v548_v15 = vld [vmem:[#allocation4 + $0x28] sm:$0xff]  }
  0x3a   :  { %v68_v14 = vld [vmem:[%s773_s0] sm:$0xff]  ;;  %v549_v17 = vld [vmem:[#allocation4 + $0x30] sm:$0xff]   ;;  %v550_v18 = vld [vmem:[#allocation4 + $0x38] sm:$0xff]  }
  0x3b   :  { %v86_v16 = vpack.c.bf16 %v68_v14, %v68_v14  ;;  %v551_v19 = vld [vmem:[#allocation6] sm:$0xff]   ;;  %v552_v20 = vld [vmem:[#allocation6 + $0x8] sm:$0xff]   ;;  %v553_v21 = vld [vmem:[#allocation6 + $0x10] sm:$0xff]  }
  0x3c   :  { %471 = vmatpush3.bf16.msra.mxu0 %v536_v2  ;;  %491 = vmatpush3.bf16.msra.mxu1 %v544_v6  ;;  %v554_v22 = vld [vmem:[#allocation6 + $0x18] sm:$0xff]   ;;  %v555_v23 = vld [vmem:[#allocation6 + $0x20] sm:$0xff]   ;;  %v556_v24 = vld [vmem:[#allocation6 + $0x28] sm:$0xff]  }
  0x3d   :  { %472 = vmatprep.subr.bf16.mxu0 %v634_v0  ;;  %492 = vmatprep.subr.bf16.mxu1 %v634_v0  ;;  %v414_v25 = vld [vmem:[%s775_s2] ss:$0 sm:$0xff]  ;;  %v557_v33 = vld [vmem:[#allocation6 + $0x30] sm:$0xff]   ;;  %v558_v34 = vld [vmem:[#allocation6 + $0x38] sm:$0xff]  }
  0x3e   :  { %v423_v35 = vld [vmem:[%s777_s4] ss:$0 sm:$0xff] }
  0x3f   :  { %v432_v43 = vld [vmem:[%s779_s6] ss:$0 sm:$0xff] }
  0x40   :  { %473 = vmatpush3.bf16.msra.mxu0 %v537_v3  ;;  %493 = vmatpush3.bf16.msra.mxu1 %v545_v8 }
  0x41   :  { %474 = vmatprep.subr.bf16.mxu0 %v634_v0  ;;  %494 = vmatprep.subr.bf16.mxu1 %v634_v0 }
  0x44   :  { %475 = vmatpush3.bf16.msra.mxu0 %v538_v5  ;;  %495 = vmatpush3.bf16.msra.mxu1 %v546_v10 }
  0x45   :  { %476 = vmatprep.subr.bf16.mxu0 %v634_v0  ;;  %496 = vmatprep.subr.bf16.mxu1 %v634_v0 }
  0x48   :  { %477 = vmatpush3.bf16.msra.mxu0 %v539_v7  ;;  %497 = vmatpush3.bf16.msra.mxu1 %v547_v12 }
  0x49   :  { %478 = vmatprep.subr.bf16.mxu0 %v634_v0  ;;  %498 = vmatprep.subr.bf16.mxu1 %v634_v0 }
  0x4c   :  { %479 = vmatpush3.bf16.msra.mxu0 %v540_v9  ;;  %499 = vmatpush3.bf16.msra.mxu1 %v548_v15 }
  0x4d   :  { %480 = vmatprep.subr.bf16.mxu0 %v634_v0  ;;  %500 = vmatprep.subr.bf16.mxu1 %v634_v0 }
  0x50   :  { %481 = vmatpush3.bf16.msra.mxu0 %v541_v11  ;;  %501 = vmatpush3.bf16.msra.mxu1 %v549_v17 }
  0x51   :  { %482 = vmatprep.subr.bf16.mxu0 %v634_v0  ;;  %502 = vmatprep.subr.bf16.mxu1 %v634_v0 }
  0x54   :  { %483 = vmatpush3.bf16.msra.mxu0 %v542_v13  ;;  %503 = vmatpush3.bf16.msra.mxu1 %v550_v18 }
  0x55   :  { %508 = vmatprep.subr.bf16.mxu0 %v634_v0 }
  0x57   :  { %485 = vmatmul.mubr.bf16.vlgmr.msra.gmra.mrb[0].mxu0 %v86_v16 }
  0x58   :  { %524 = vmatprep.mubr.msk.bf16.mxu0 %vm635_vm0, %v634_v0  ;;  %509 = vmatpush3.bf16.msra.mxu0 %v551_v19 }
  0x59   :  { %510 = vmatprep.subr.bf16.mxu0 %v634_v0 }
  0x5c   :  { %511 = vmatpush3.bf16.msra.mxu0 %v552_v20 }
  0x5d   :  { %512 = vmatprep.subr.bf16.mxu0 %v634_v0 }
  0x60   :  { %513 = vmatpush3.bf16.msra.mxu0 %v553_v21 }
  0x61   :  { %514 = vmatprep.subr.bf16.mxu0 %v634_v0 }
  0x64   :  { %515 = vmatpush3.bf16.msra.mxu0 %v554_v22 }
  0x65   :  { %516 = vmatprep.subr.bf16.mxu0 %v634_v0 }
  0x68   :  { %517 = vmatpush3.bf16.msra.mxu0 %v555_v23 }
  0x69   :  { %518 = vmatprep.subr.bf16.mxu0 %v634_v0 }
  0x6c   :  { %519 = vmatpush3.bf16.msra.mxu0 %v556_v24 }
  0x6d   :  { %520 = vmatprep.subr.bf16.mxu0 %v634_v0 }
  0x70   :  { %521 = vmatpush3.bf16.msra.mxu0 %v557_v33 }
  0x71   :  { %522 = vmatprep.subr.bf16.mxu0 %v634_v0 }
  0x74   :  { %523 = vmatpush3.bf16.msra.mxu0 %v558_v34 }
 0x12a   :  { %v175_v26 = vpop.f32.mrb[0].mxu0 }
 0x12b   :  { %v176_v27 = vadd.f32 %v414_v25, %v175_v26  ;;  %v486_v28 = vpop.f32.mrb[1].mxu0 }
 0x12c   :  { %v178_v29 = vpop.f32.mrb[2].mxu0 }
 0x12d   :  { %v181_v30 = vmax.f32 %v176_v27, 0.0  ;;  %v487_v31 = vpop.f32.mrb[3].mxu0 }
 0x12f   :  { %v199_v32 = vpack.c.bf16 %v181_v30, %v181_v30 }
 0x131   :  { %505 = vmatmul.mubr.bf16.vlgmr.msra.gmra.mrb[0].mxu1 %v199_v32 }
 0x204   :  { %v288_v36 = vpop.f32.mrb[0].mxu1 }
 0x205   :  { %v289_v37 = vadd.f32 %v423_v35, %v288_v36  ;;  %v506_v38 = vpop.f32.mrb[1].mxu1 }
 0x206   :  { %v291_v39 = vpop.f32.mrb[2].mxu1 }
 0x207   :  { %v294_v40 = vmax.f32 %v289_v37, 0.0  ;;  %v507_v41 = vpop.f32.mrb[3].mxu1 }
 0x209   :  { %v312_v42 = vpack.c.bf16 %v294_v40, %v294_v40 }
 0x20b   :  { %525 = vmatmul.mubr.bf16.vlgmr.msra.gmra.mrb[4].mxu0 %v312_v42 }
 0x2de   :  { %v401_v44 = vpop.f32.mrb[4].mxu0 }
 0x2df   :  { %v402_v45 = vadd.f32 %v432_v43, %v401_v44  ;;  %v526_v46 = vpop.f32.mrb[5].mxu0 }
 0x2e0   :  { %v404_v47 = vpop.f32.mrb[6].mxu0 }
 0x2e1   :  { %407 = vst [vmem:[%s780_s7] sm:$0xff] %v402_v45  ;;  %v527_v48 = vpop.f32.mrb[7].mxu0 }
 0x2e2   :  { %412 = vsyncpa [#allocation3], 1 }
 0x2e3   :  { %413 = vsyncpa [#allocation5], 1 }

// kernel: _forward_jit.1
= control target key start
LH: loop header
LB: loop body
LE: loop exit
PB: predicated region body
PF: predicated region fallthrough
CT: control target
= control target key end

     0   :  { %12 = vsyncpa [#allocation3], 0  ;;  %s773_s0 = inlined_call_operand.vmem [shape: f32[8,128], index: 0, kind: input, shape index: {}]   ;;  %s774_s1 = inlined_call_operand.hbm [shape: bf16[128,128], index: 1, kind: input, shape index: {}]   ;;  %s775_s2 = inlined_call_operand.vmem [shape: f32[1,128], index: 2, kind: input, shape index: {}]   ;;  %s776_s3 = inlined_call_operand.hbm [shape: bf16[128,128], index: 3, kind: input, shape index: {}]   ;;  %s777_s4 = inlined_call_operand.vmem [shape: f32[1,128], index: 4, kind: input, shape index: {}]   ;;  %s778_s5 = inlined_call_operand.hbm [shape: bf16[128,128], index: 5, kind: input, shape index: {}]   ;;  %s779_s6 = inlined_call_operand.vmem [shape: f32[1,128], index: 6, kind: input, shape index: {}]   ;;  %s780_s7 = inlined_call_operand.vmem [shape: f32[8,128], index: 7, kind: output, shape index: {}]  }
   0x1   :  { %13 = vsyncpa [#allocation5], 0  ;;  %s629_s24 = smov [#allocation4]   ;;  %s630_s26 = smov [#allocation2]  }
   0x2   :  { %s35_s25 = sshll.u32 %s629_s24, 4  ;;  %s21_s27 = sshll.u32 %s630_s26, 4  ;;  %s36_s25 = int_to_ptr.vmem [resolvable:$true] %s35_s25  ;;  %s676_s27 = int_to_ptr.vmem [resolvable:$true] %s21_s27 }
   0x3   :  { %s559_s30 = scalar_lea.hbm %s776_s3, 1024 }
   0x4   :  { %p560_p0 = scmp.ne.s32.totalorder %s776_s3, %s559_s30  ;;  %p563_p1 = scmp.lt.u32.totalorder %s559_s30, %s776_s3 }
   0x6   :  { %p565_p2 = pnand %p563_p1, %p560_p0 }
   0x8   :  { %568 = shalt.err (!%p565_p2)
}
   0x9   :  { %s569_s12 = scalar_lea.vmem %s36_s25, 1024  ;;  %p574_p4 = scmp.lt.s32.totalorder %s36_s25, %s36_s25 }
   0xa   :  { %p570_p3 = scmp.ne.s32.totalorder %s36_s25, %s569_s12  ;;  %p575_p5 = scmp.lt.s32.totalorder %s569_s12, %s569_s12 }
   0xc   :  { %p576_p6 = por %p575_p5, %p574_p4 }
   0xe   :  { %p577_p7 = pnand %p576_p6, %p570_p3 }
  0x10   :  { %580 = shalt.err (!%p577_p7)
}
  0x11   :  { %s631_s13 = smov 64   ;;  %s632_s14 = smov 4  }
  0x12   :  { %41 = dma.hbm_to_vmem [thread:$0]  %s776_s3, 1024, %s36_s25, [#allocation5], %s631_s13, %s631_s13, %s632_s14  }
  0x13   :  { %s581_s19 = scalar_lea.hbm %s774_s1, 1024 }
  0x14   :  { %p582_p8 = scmp.ne.s32.totalorder %s774_s1, %s581_s19  ;;  %p585_p9 = scmp.lt.u32.totalorder %s581_s19, %s774_s1 }
  0x16   :  { %p587_p10 = pnand %p585_p9, %p582_p8 }
  0x18   :  { %590 = shalt.err (!%p587_p10)
}
  0x19   :  { %s591_s24 = scalar_lea.vmem %s676_s27, 1024  ;;  %p596_p12 = scmp.lt.s32.totalorder %s676_s27, %s676_s27 }
  0x1a   :  { %p592_p11 = scmp.ne.s32.totalorder %s676_s27, %s591_s24  ;;  %p597_p13 = scmp.lt.s32.totalorder %s591_s24, %s591_s24 }
  0x1c   :  { %p598_p0 = por %p597_p13, %p596_p12 }
  0x1e   :  { %p599_p1 = pnand %p598_p0, %p592_p11 }
  0x20   :  { %602 = shalt.err (!%p599_p1)
}
  0x21   :  { %27 = dma.hbm_to_vmem [thread:$0]  %s774_s1, 1024, %s676_s27, [#allocation3], %s631_s13, %s631_s13, %s632_s14  }
  0x22   :  { %s633_s26 = smov [#allocation6]   ;;  %s603_s8 = scalar_lea.hbm %s778_s5, 1024 }
  0x23   :  { %s49_s28 = sshll.u32 %s633_s26, 4  ;;  %p604_p2 = scmp.ne.s32.totalorder %s778_s5, %s603_s8  ;;  %s50_s28 = int_to_ptr.vmem [resolvable:$true] %s49_s28 }
  0x24   :  { %p607_p3 = scmp.lt.u32.totalorder %s603_s8, %s778_s5 }
  0x26   :  { %p609_p4 = pnand %p607_p3, %p604_p2 }
  0x28   :  { %612 = shalt.err (!%p609_p4)
}
  0x29   :  { %s613_s15 = scalar_lea.vmem %s50_s28, 1024  ;;  %p618_p6 = scmp.lt.s32.totalorder %s50_s28, %s50_s28 }
  0x2a   :  { %p614_p5 = scmp.ne.s32.totalorder %s50_s28, %s613_s15  ;;  %p619_p7 = scmp.lt.s32.totalorder %s613_s15, %s613_s15 }
  0x2c   :  { %p620_p8 = por %p619_p7, %p618_p6 }
  0x2e   :  { %p621_p9 = pnand %p620_p8, %p614_p5 }
  0x30   :  { %624 = shalt.err (!%p621_p9)
}
  0x31   :  { %55 = dma.hbm_to_vmem [thread:$0]  %s778_s5, 1024, %s50_s28, [#allocation5], %s631_s13, %s631_s13, %s632_s14  }
  0x32   :  { %625 = dma.done.wait [#allocation3], 1024  }
  0x33   :  { %626 = vsyncadd [#allocation3], 4294966272 }
  0x34   :  { %627 = dma.done.wait [#allocation5], 2048  }
  0x35   :  { %628 = vsyncadd [#allocation5], 4294965248  ;;  %v634_v0 = vmov 0.0   ;;  %vm635_vm0 = vmmov 0   ;;  %v535_v1 = vld [vmem:[#allocation2] sm:$0xff]   ;;  %v536_v2 = vld [vmem:[#allocation2 + $0x8] sm:$0xff]  }
  0x36   :  { %468 = vmatprep.subr.bf16.mxu0 %v634_v0  ;;  %484 = vmatprep.mubr.msk.bf16.mxu0 %vm635_vm0, %v634_v0  ;;  %v537_v3 = vld [vmem:[#allocation2 + $0x10] sm:$0xff]   ;;  %v543_v4 = vld [vmem:[#allocation4] sm:$0xff]   ;;  %v538_v5 = vld [vmem:[#allocation2 + $0x18] sm:$0xff]  }
  0x37   :  { %488 = vmatprep.subr.bf16.mxu1 %v634_v0  ;;  %504 = vmatprep.mubr.msk.bf16.mxu1 %vm635_vm0, %v634_v0  ;;  %v544_v6 = vld [vmem:[#allocation4 + $0x8] sm:$0xff]   ;;  %v539_v7 = vld [vmem:[#allocation2 + $0x20] sm:$0xff]   ;;  %v545_v8 = vld [vmem:[#allocation4 + $0x10] sm:$0xff]  }
  0x38   :  { %469 = vmatpush3.bf16.msra.mxu0 %v535_v1  ;;  %489 = vmatpush3.bf16.msra.mxu1 %v543_v4  ;;  %v540_v9 = vld [vmem:[#allocation2 + $0x28] sm:$0xff]   ;;  %v546_v10 = vld [vmem:[#allocation4 + $0x18] sm:$0xff]   ;;  %v541_v11 = vld [vmem:[#allocation2 + $0x30] sm:$0xff]  }
  0x39   :  { %470 = vmatprep.subr.bf16.mxu0 %v634_v0  ;;  %490 = vmatprep.subr.bf16.mxu1 %v634_v0  ;;  %v547_v12 = vld [vmem:[#allocation4 + $0x20] sm:$0xff]   ;;  %v542_v13 = vld [vmem:[#allocation2 + $0x38] sm:$0xff]   ;;  %v548_v15 = vld [vmem:[#allocation4 + $0x28] sm:$0xff]  }
  0x3a   :  { %v68_v14 = vld [vmem:[%s773_s0] sm:$0xff]  ;;  %v549_v17 = vld [vmem:[#allocation4 + $0x30] sm:$0xff]   ;;  %v550_v18 = vld [vmem:[#allocation4 + $0x38] sm:$0xff]  }
  0x3b   :  { %v86_v16 = vpack.c.bf16 %v68_v14, %v68_v14  ;;  %v551_v19 = vld [vmem:[#allocation6] sm:$0xff]   ;;  %v552_v20 = vld [vmem:[#allocation6 + $0x8] sm:$0xff]   ;;  %v553_v21 = vld [vmem:[#allocation6 + $0x10] sm:$0xff]  }
  0x3c   :  { %471 = vmatpush3.bf16.msra.mxu0 %v536_v2  ;;  %491 = vmatpush3.bf16.msra.mxu1 %v544_v6  ;;  %v554_v22 = vld [vmem:[#allocation6 + $0x18] sm:$0xff]   ;;  %v555_v23 = vld [vmem:[#allocation6 + $0x20] sm:$0xff]   ;;  %v556_v24 = vld [vmem:[#allocation6 + $0x28] sm:$0xff]  }
  0x3d   :  { %472 = vmatprep.subr.bf16.mxu0 %v634_v0  ;;  %492 = vmatprep.subr.bf16.mxu1 %v634_v0  ;;  %v414_v25 = vld [vmem:[%s775_s2] ss:$0 sm:$0xff]  ;;  %v557_v33 = vld [vmem:[#allocation6 + $0x30] sm:$0xff]   ;;  %v558_v34 = vld [vmem:[#allocation6 + $0x38] sm:$0xff]  }
  0x3e   :  { %v423_v35 = vld [vmem:[%s777_s4] ss:$0 sm:$0xff] }
  0x3f   :  { %v432_v43 = vld [vmem:[%s779_s6] ss:$0 sm:$0xff] }
  0x40   :  { %473 = vmatpush3.bf16.msra.mxu0 %v537_v3  ;;  %493 = vmatpush3.bf16.msra.mxu1 %v545_v8 }
  0x41   :  { %474 = vmatprep.subr.bf16.mxu0 %v634_v0  ;;  %494 = vmatprep.subr.bf16.mxu1 %v634_v0 }
  0x44   :  { %475 = vmatpush3.bf16.msra.mxu0 %v538_v5  ;;  %495 = vmatpush3.bf16.msra.mxu1 %v546_v10 }
  0x45   :  { %476 = vmatprep.subr.bf16.mxu0 %v634_v0  ;;  %496 = vmatprep.subr.bf16.mxu1 %v634_v0 }
  0x48   :  { %477 = vmatpush3.bf16.msra.mxu0 %v539_v7  ;;  %497 = vmatpush3.bf16.msra.mxu1 %v547_v12 }
  0x49   :  { %478 = vmatprep.subr.bf16.mxu0 %v634_v0  ;;  %498 = vmatprep.subr.bf16.mxu1 %v634_v0 }
  0x4c   :  { %479 = vmatpush3.bf16.msra.mxu0 %v540_v9  ;;  %499 = vmatpush3.bf16.msra.mxu1 %v548_v15 }
  0x4d   :  { %480 = vmatprep.subr.bf16.mxu0 %v634_v0  ;;  %500 = vmatprep.subr.bf16.mxu1 %v634_v0 }
  0x50   :  { %481 = vmatpush3.bf16.msra.mxu0 %v541_v11  ;;  %501 = vmatpush3.bf16.msra.mxu1 %v549_v17 }
  0x51   :  { %482 = vmatprep.subr.bf16.mxu0 %v634_v0  ;;  %502 = vmatprep.subr.bf16.mxu1 %v634_v0 }
  0x54   :  { %483 = vmatpush3.bf16.msra.mxu0 %v542_v13  ;;  %503 = vmatpush3.bf16.msra.mxu1 %v550_v18 }
  0x55   :  { %508 = vmatprep.subr.bf16.mxu0 %v634_v0 }
  0x57   :  { %485 = vmatmul.mubr.bf16.vlgmr.msra.gmra.mrb[0].mxu0 %v86_v16 }
  0x58   :  { %524 = vmatprep.mubr.msk.bf16.mxu0 %vm635_vm0, %v634_v0  ;;  %509 = vmatpush3.bf16.msra.mxu0 %v551_v19 }
  0x59   :  { %510 = vmatprep.subr.bf16.mxu0 %v634_v0 }
  0x5c   :  { %511 = vmatpush3.bf16.msra.mxu0 %v552_v20 }
  0x5d   :  { %512 = vmatprep.subr.bf16.mxu0 %v634_v0 }
  0x60   :  { %513 = vmatpush3.bf16.msra.mxu0 %v553_v21 }
  0x61   :  { %514 = vmatprep.subr.bf16.mxu0 %v634_v0 }
  0x64   :  { %515 = vmatpush3.bf16.msra.mxu0 %v554_v22 }
  0x65   :  { %516 = vmatprep.subr.bf16.mxu0 %v634_v0 }
  0x68   :  { %517 = vmatpush3.bf16.msra.mxu0 %v555_v23 }
  0x69   :  { %518 = vmatprep.subr.bf16.mxu0 %v634_v0 }
  0x6c   :  { %519 = vmatpush3.bf16.msra.mxu0 %v556_v24 }
  0x6d   :  { %520 = vmatprep.subr.bf16.mxu0 %v634_v0 }
  0x70   :  { %521 = vmatpush3.bf16.msra.mxu0 %v557_v33 }
  0x71   :  { %522 = vmatprep.subr.bf16.mxu0 %v634_v0 }
  0x74   :  { %523 = vmatpush3.bf16.msra.mxu0 %v558_v34 }
 0x12a   :  { %v175_v26 = vpop.f32.mrb[0].mxu0 }
 0x12b   :  { %v176_v27 = vadd.f32 %v414_v25, %v175_v26  ;;  %v486_v28 = vpop.f32.mrb[1].mxu0 }
 0x12c   :  { %v178_v29 = vpop.f32.mrb[2].mxu0 }
 0x12d   :  { %v181_v30 = vmax.f32 %v176_v27, 0.0  ;;  %v487_v31 = vpop.f32.mrb[3].mxu0 }
 0x12f   :  { %v199_v32 = vpack.c.bf16 %v181_v30, %v181_v30 }
 0x131   :  { %505 = vmatmul.mubr.bf16.vlgmr.msra.gmra.mrb[0].mxu1 %v199_v32 }
 0x204   :  { %v288_v36 = vpop.f32.mrb[0].mxu1 }
 0x205   :  { %v289_v37 = vadd.f32 %v423_v35, %v288_v36  ;;  %v506_v38 = vpop.f32.mrb[1].mxu1 }
 0x206   :  { %v291_v39 = vpop.f32.mrb[2].mxu1 }
 0x207   :  { %v294_v40 = vmax.f32 %v289_v37, 0.0  ;;  %v507_v41 = vpop.f32.mrb[3].mxu1 }
 0x209   :  { %v312_v42 = vpack.c.bf16 %v294_v40, %v294_v40 }
 0x20b   :  { %525 = vmatmul.mubr.bf16.vlgmr.msra.gmra.mrb[4].mxu0 %v312_v42 }
 0x2de   :  { %v401_v44 = vpop.f32.mrb[4].mxu0 }
 0x2df   :  { %v402_v45 = vadd.f32 %v432_v43, %v401_v44  ;;  %v526_v46 = vpop.f32.mrb[5].mxu0 }
 0x2e0   :  { %v404_v47 = vpop.f32.mrb[6].mxu0 }
 0x2e1   :  { %407 = vst [vmem:[%s780_s7] sm:$0xff] %v402_v45  ;;  %v527_v48 = vpop.f32.mrb[7].mxu0 }
 0x2e2   :  { %412 = vsyncpa [#allocation3], 1 }
 0x2e3   :  { %413 = vsyncpa [#allocation5], 1 }

</bundles_post_ra>
